<compile_context>
chip_gen: v6e
topology: v6e:2x2x1
jax: 0.10.0
libtpu: 0.0.40
codegen_flags: <defaults>
</compile_context>

<pallas_src>
import math
from functools import partial

import jax
import jax.numpy as jnp
from jax import lax
from jax.experimental import pallas as pl
from jax.experimental.pallas import tpu as pltpu


# ----------------------------------------------------------------------------
# Pallas kernel: one invocation, everything VMEM-resident.
# ----------------------------------------------------------------------------
def _sparse_attn_kernel(x_ref, wqkv_ref, bqkv_ref, wo_ref, bo_ref, mask_ref,
                        out_ref, o_scratch, *,
                        n_heads, n_modalities, seq_len, d_model):
    H, M, S, D = n_heads, n_modalities, seq_len, d_model
    dh = D // H
    scale = 1.0 / math.sqrt(dh)

    x = x_ref[...]                                     # (M*S, D) all modalities
    mask = mask_ref[...]                               # (M*S, M*S) block-diag additive

    # Fused QKV projection: one MXU push (M*S, D) @ (D, 3D).
    qkv = jnp.dot(x, wqkv_ref[...],
                  preferred_element_type=jnp.float32) + bqkv_ref[...]
    q = qkv[:, 0:D] * scale                            # (M*S, D)
    k = qkv[:, D:2 * D]
    v = qkv[:, 2 * D:3 * D]

    # Per-head attention, batched over modalities via the block-diagonal mask.
    for h in range(H):
        c0 = h * dh
        qh = q[:, c0:c0 + dh]                          # (M*S, dh)
        kh = k[:, c0:c0 + dh]
        vh = v[:, c0:c0 + dh]

        s = lax.dot_general(qh, kh, (((1,), (1,)), ((), ())),
                            preferred_element_type=jnp.float32)   # (M*S, M*S)
        s = s + mask
        s = s - jnp.max(s, axis=-1, keepdims=True)
        p = jnp.exp(s)
        p = p * pl.reciprocal(jnp.sum(p, axis=-1, keepdims=True), approx=True)

        # Head output written lane-wise into the scratch -> single out-proj below.
        o_scratch[:, c0:c0 + dh] = jnp.dot(p, vh,
                                           preferred_element_type=jnp.float32)

    # Single output projection for all modalities/heads: (M*S, D) @ (D, D).
    attn = jnp.dot(o_scratch[...], wo_ref[...],
                   preferred_element_type=jnp.float32)             # (M*S, D)

    # attended.mean(dim=0): sum modality row-blocks, scale once, add bias once.
    acc = jnp.zeros((S, D), jnp.float32)
    for m in range(M):
        acc = acc + attn[m * S:(m + 1) * S, :]
    out_ref[...] = acc * (1.0 / M) + bo_ref[...]


# ----------------------------------------------------------------------------
# Wrapper / glue
# ----------------------------------------------------------------------------
def sparse_cross_modal_attention(all_features, mask, params, n_heads):
    """all_features: (M, S, D) f32; mask: (S, S) f32 additive; returns (S, D)."""
    M, S, D = all_features.shape
    wq, wk, wv, bq, bk, bv, wo, bo = params

    # Fuse QKV weights/biases (plain JAX, outside the kernel).
    wqkv = jnp.concatenate([wq, wk, wv], axis=1)       # (D, 3D)
    bqkv = jnp.concatenate([bq, bk, bv], axis=1)       # (1, 3D)

    # Flatten modalities into the row axis.
    x_flat = all_features.reshape(M * S, D)            # (M*S, D)

    # Block-diagonal additive mask: diagonal blocks carry the (S,S) sparse
    # mask, off-diagonal blocks get -1e30 ("never attend"), which makes one
    # big (M*S, M*S) softmax exactly equal to M independent per-modality
    # softmaxes (off-block exp underflows to 0.0 in f32).
    eye = jnp.eye(M, dtype=jnp.float32)
    big_mask = (jnp.kron(eye, mask)
                + jnp.kron(1.0 - eye, jnp.full((S, S), -1e30, jnp.float32)))

    kernel = partial(_sparse_attn_kernel, n_heads=n_heads, n_modalities=M,
                     seq_len=S, d_model=D)
    out = pl.pallas_call(
        kernel,
        out_shape=jax.ShapeDtypeStruct((S, D), jnp.float32),
        grid=(1,),
        in_specs=[
            pl.BlockSpec((M * S, D), lambda i: (0, 0)),        # x (all modalities)
            pl.BlockSpec((D, 3 * D), lambda i: (0, 0)),        # Wqkv fused
            pl.BlockSpec((1, 3 * D), lambda i: (0, 0)),        # bqkv fused
            pl.BlockSpec((D, D), lambda i: (0, 0)),            # Wo
            pl.BlockSpec((1, D), lambda i: (0, 0)),            # bo
            pl.BlockSpec((M * S, M * S), lambda i: (0, 0)),    # block-diag mask
        ],
        out_specs=pl.BlockSpec((S, D), lambda i: (0, 0)),
        scratch_shapes=[pltpu.VMEM((M * S, D), jnp.float32)],  # head-output slab
        compiler_params=pltpu.CompilerParams(
            dimension_semantics=("arbitrary",)),
    )(x_flat, wqkv, bqkv, wo, bo, big_mask)
    return out


def stack_and_pad(features):
    """Mirror of the torch preprocessing: dim fixup + pad to max seq + concat."""
    feats, order = [], []
    for mod, f in features.items():
        if f.ndim == 1:
            f = f[None, None, :]
        elif f.ndim == 2:
            f = f[None, :, :]
        feats.append(f)
        order.append(mod)
    max_s = max(f.shape[1] for f in feats)
    feats = [jnp.pad(f, ((0, 0), (0, max_s - f.shape[1]), (0, 0))) for f in feats]
    return jnp.concatenate(feats, axis=0), order


def create_sparse_mask(modality_order, routing_weights, sparsity):
    """weight_matrix[i,j] = rw[i]*rw[j]; entries below the (1-sparsity)
    quantile get -1e9 (additive mask), matching the torch module."""
    n = len(modality_order)
    if n <= 1:
        return jnp.zeros((n, n), jnp.float32)
    w = jnp.array(
        [[routing_weights.get(m1, 0.0) * routing_weights.get(m2, 0.0)
          for m2 in modality_order] for m1 in modality_order],
        dtype=jnp.float32)
    threshold = jnp.quantile(w.flatten(), 1.0 - sparsity)  # linear interp, same as torch
    return (w < threshold).astype(jnp.float32) * -1e9


def init_params(key, d_model):
    """Deterministic synthetic init of nn.MultiheadAttention parameters."""
    k1, k2, k3 = jax.random.split(key, 3)
    in_proj_w = jax.random.normal(k1, (3 * d_model, d_model), jnp.float32) * 0.1  # torch (out,in)
    in_proj_b = jax.random.normal(k2, (3 * d_model,), jnp.float32) * 0.1
    out_proj_w = jax.random.normal(k3, (d_model, d_model), jnp.float32) * 0.1
    out_proj_b = jnp.zeros((d_model,), jnp.float32)
    D = d_model
    wq = in_proj_w[:D, :].T
    wk = in_proj_w[D:2 * D, :].T
    wv = in_proj_w[2 * D:, :].T
    bq = in_proj_b[:D][None, :]
    bk = in_proj_b[D:2 * D][None, :]
    bv = in_proj_b[2 * D:][None, :]
    wo = out_proj_w.T
    bo = out_proj_b[None, :]
    return (wq, wk, wv, bq, bk, bv, wo, bo)


if __name__ == "__main__":
    d_model, n_heads, sparsity = 32, 4, 0.1
    seq_len = 4  # chosen equal to n_modalities so the torch attn_mask is well-formed

    key = jax.random.PRNGKey(0)
    kp, kv1, kv2, kv3, kv4 = jax.random.split(key, 5)
    params = init_params(kp, d_model)

    # Four modalities, each a 2-D (seq, d_model) feature tensor.
    features = {
        "vision": jax.random.normal(kv1, (seq_len, d_model), jnp.float32),
        "audio":  jax.random.normal(kv2, (seq_len, d_model), jnp.float32),
        "text":   jax.random.normal(kv3, (seq_len, d_model), jnp.float32),
        "imu":    jax.random.normal(kv4, (seq_len, d_model), jnp.float32),
    }
    routing_weights = {"vision": 0.9, "audio": 0.5, "text": 0.7, "imu": 0.2}

    all_features, order = stack_and_pad(features)                # (M, S, D) = (4, 4, 32)
    mask = create_sparse_mask(order, routing_weights, sparsity)  # (S, S) = (4, 4)

    attended_mean = sparse_cross_modal_attention(all_features, mask, params, n_heads)
    result = jnp.squeeze(attended_mean)                          # matches .mean(dim=0).squeeze()
    jax.block_until_ready(result)

    assert result.shape == (seq_len, d_model)
    assert bool(jnp.all(jnp.isfinite(result)))
    print("KERNEL_OK")
</pallas_src>

<mosaic_0001>
module attributes {stable_mosaic.version = 11 : i64} {
  func.func @_sparse_attn_kernel(%arg0: i32, %arg1: memref<16x32xf32, #tpu.memory_space<vmem>>, %arg2: memref<32x96xf32, #tpu.memory_space<vmem>>, %arg3: memref<1x96xf32, #tpu.memory_space<vmem>>, %arg4: memref<32x32xf32, #tpu.memory_space<vmem>>, %arg5: memref<1x32xf32, #tpu.memory_space<vmem>>, %arg6: memref<16x16xf32, #tpu.memory_space<vmem>>, %arg7: memref<4x32xf32, #tpu.memory_space<vmem>>, %arg8: memref<16x32xf32, #tpu.memory_space<vmem>>) attributes {dimension_semantics = [#tpu.dimension_semantics<arbitrary>], iteration_bounds = array<i64: 1>, scalar_prefetch = 0 : i64, scratch_operands = 1 : i64, tpu.core_type = #tpu.core_type<tc>, window_params = [{pipeline_mode = #tpu.pipeline_mode<synchronous>, transform_indices = @transform_0, window_bounds = array<i64: 16, 32>}, {pipeline_mode = #tpu.pipeline_mode<synchronous>, transform_indices = @transform_1, window_bounds = array<i64: 32, 96>}, {pipeline_mode = #tpu.pipeline_mode<synchronous>, transform_indices = @transform_2, window_bounds = array<i64: 1, 96>}, {pipeline_mode = #tpu.pipeline_mode<synchronous>, transform_indices = @transform_3, window_bounds = array<i64: 32, 32>}, {pipeline_mode = #tpu.pipeline_mode<synchronous>, transform_indices = @transform_4, window_bounds = array<i64: 1, 32>}, {pipeline_mode = #tpu.pipeline_mode<synchronous>, transform_indices = @transform_5, window_bounds = array<i64: 16, 16>}, {pipeline_mode = #tpu.pipeline_mode<synchronous>, transform_indices = @transform_6, window_bounds = array<i64: 4, 32>}]} {
    %c0 = arith.constant 0 : index
    %c0_0 = arith.constant 0 : index
    %0 = vector.load %arg1[%c0, %c0_0] : memref<16x32xf32, #tpu.memory_space<vmem>>, vector<16x32xf32>
    %c0_1 = arith.constant 0 : index
    %c0_2 = arith.constant 0 : index
    %1 = vector.load %arg6[%c0_1, %c0_2] : memref<16x16xf32, #tpu.memory_space<vmem>>, vector<16x16xf32>
    %c0_3 = arith.constant 0 : index
    %c0_4 = arith.constant 0 : index
    %2 = vector.load %arg2[%c0_3, %c0_4] : memref<32x96xf32, #tpu.memory_space<vmem>>, vector<32x96xf32>
    %cst = arith.constant dense<0.000000e+00> : vector<16x96xf32>
    %3 = tpu.matmul %0, %2, %cst {dimension_numbers = #tpu.dot_dimension_numbers<[1], [0], [0], [1], [0, 0, 1, 1], [], []>} : vector<16x32xf32>, vector<32x96xf32>, vector<16x96xf32> -> vector<16x96xf32>
    %c0_5 = arith.constant 0 : index
    %c0_6 = arith.constant 0 : index
    %4 = vector.load %arg3[%c0_5, %c0_6] : memref<1x96xf32, #tpu.memory_space<vmem>>, vector<1x96xf32>
    %5 = vector.broadcast %4 : vector<1x96xf32> to vector<16x96xf32>
    %6 = arith.addf %3, %5 : vector<16x96xf32>
    %7 = vector.extract_strided_slice %6 {offsets = [0, 0], sizes = [16, 32], strides = [1, 1]} : vector<16x96xf32> to vector<16x32xf32>
    %cst_7 = arith.constant 0.353553385 : f32
    %8 = vector.broadcast %cst_7 : f32 to vector<16x32xf32>
    %9 = arith.mulf %7, %8 : vector<16x32xf32>
    %10 = vector.extract_strided_slice %6 {offsets = [0, 32], sizes = [16, 32], strides = [1, 1]} : vector<16x96xf32> to vector<16x32xf32>
    %11 = vector.extract_strided_slice %6 {offsets = [0, 64], sizes = [16, 32], strides = [1, 1]} : vector<16x96xf32> to vector<16x32xf32>
    %12 = vector.extract_strided_slice %9 {offsets = [0, 0], sizes = [16, 8], strides = [1, 1]} : vector<16x32xf32> to vector<16x8xf32>
    %13 = vector.extract_strided_slice %10 {offsets = [0, 0], sizes = [16, 8], strides = [1, 1]} : vector<16x32xf32> to vector<16x8xf32>
    %14 = vector.extract_strided_slice %11 {offsets = [0, 0], sizes = [16, 8], strides = [1, 1]} : vector<16x32xf32> to vector<16x8xf32>
    %cst_8 = arith.constant dense<0.000000e+00> : vector<16x16xf32>
    %15 = tpu.matmul %12, %13, %cst_8 {dimension_numbers = #tpu.dot_dimension_numbers<[1], [1], [0], [0], [0, 0, 1, 0], [], []>} : vector<16x8xf32>, vector<16x8xf32>, vector<16x16xf32> -> vector<16x16xf32>
    %16 = arith.addf %15, %1 : vector<16x16xf32>
    %cst_9 = arith.constant dense<0xFF800000> : vector<16xf32>
    %17 = vector.multi_reduction <maximumf>, %16, %cst_9 [1] : vector<16x16xf32> to vector<16xf32>
    %18 = vector.shape_cast %17 : vector<16xf32> to vector<16x1xf32>
    %19 = vector.broadcast %18 : vector<16x1xf32> to vector<16x16xf32>
    %20 = arith.subf %16, %19 : vector<16x16xf32>
    %21 = math.exp %20 : vector<16x16xf32>
    %cst_10 = arith.constant dense<0.000000e+00> : vector<16xf32>
    %22 = vector.multi_reduction <add>, %21, %cst_10 [1] : vector<16x16xf32> to vector<16xf32>
    %23 = vector.shape_cast %22 : vector<16xf32> to vector<16x1xf32>
    %24 = tpu.reciprocal %23 {approx = true} : vector<16x1xf32> -> vector<16x1xf32>
    %25 = vector.broadcast %24 : vector<16x1xf32> to vector<16x16xf32>
    %26 = arith.mulf %21, %25 : vector<16x16xf32>
    %cst_11 = arith.constant dense<0.000000e+00> : vector<16x8xf32>
    %27 = tpu.matmul %26, %14, %cst_11 {dimension_numbers = #tpu.dot_dimension_numbers<[1], [0], [0], [1], [0, 0, 1, 1], [], []>} : vector<16x16xf32>, vector<16x8xf32>, vector<16x8xf32> -> vector<16x8xf32>
    %c0_12 = arith.constant 0 : index
    %c0_13 = arith.constant 0 : index
    %28 = vector.load %arg8[%c0_12, %c0_13] : memref<16x32xf32, #tpu.memory_space<vmem>>, vector<16x8xf32>
    tpu.vector_store %arg8[%c0_12, %c0_13], %27 {strides = array<i32>} : memref<16x32xf32, #tpu.memory_space<vmem>>, vector<16x8xf32>,
    %29 = vector.extract_strided_slice %9 {offsets = [0, 8], sizes = [16, 8], strides = [1, 1]} : vector<16x32xf32> to vector<16x8xf32>
    %30 = vector.extract_strided_slice %10 {offsets = [0, 8], sizes = [16, 8], strides = [1, 1]} : vector<16x32xf32> to vector<16x8xf32>
    %31 = vector.extract_strided_slice %11 {offsets = [0, 8], sizes = [16, 8], strides = [1, 1]} : vector<16x32xf32> to vector<16x8xf32>
    %cst_14 = arith.constant dense<0.000000e+00> : vector<16x16xf32>
    %32 = tpu.matmul %29, %30, %cst_14 {dimension_numbers = #tpu.dot_dimension_numbers<[1], [1], [0], [0], [0, 0, 1, 0], [], []>} : vector<16x8xf32>, vector<16x8xf32>, vector<16x16xf32> -> vector<16x16xf32>
    %33 = arith.addf %32, %1 : vector<16x16xf32>
    %cst_15 = arith.constant dense<0xFF800000> : vector<16xf32>
    %34 = vector.multi_reduction <maximumf>, %33, %cst_15 [1] : vector<16x16xf32> to vector<16xf32>
    %35 = vector.shape_cast %34 : vector<16xf32> to vector<16x1xf32>
    %36 = vector.broadcast %35 : vector<16x1xf32> to vector<16x16xf32>
    %37 = arith.subf %33, %36 : vector<16x16xf32>
    %38 = math.exp %37 : vector<16x16xf32>
    %cst_16 = arith.constant dense<0.000000e+00> : vector<16xf32>
    %39 = vector.multi_reduction <add>, %38, %cst_16 [1] : vector<16x16xf32> to vector<16xf32>
    %40 = vector.shape_cast %39 : vector<16xf32> to vector<16x1xf32>
    %41 = tpu.reciprocal %40 {approx = true} : vector<16x1xf32> -> vector<16x1xf32>
    %42 = vector.broadcast %41 : vector<16x1xf32> to vector<16x16xf32>
    %43 = arith.mulf %38, %42 : vector<16x16xf32>
    %cst_17 = arith.constant dense<0.000000e+00> : vector<16x8xf32>
    %44 = tpu.matmul %43, %31, %cst_17 {dimension_numbers = #tpu.dot_dimension_numbers<[1], [0], [0], [1], [0, 0, 1, 1], [], []>} : vector<16x16xf32>, vector<16x8xf32>, vector<16x8xf32> -> vector<16x8xf32>
    %c0_18 = arith.constant 0 : index
    %c8 = arith.constant 8 : index
    %45 = vector.load %arg8[%c0_18, %c8] : memref<16x32xf32, #tpu.memory_space<vmem>>, vector<16x8xf32>
    tpu.vector_store %arg8[%c0_18, %c8], %44 {strides = array<i32>} : memref<16x32xf32, #tpu.memory_space<vmem>>, vector<16x8xf32>,
    %46 = vector.extract_strided_slice %9 {offsets = [0, 16], sizes = [16, 8], strides = [1, 1]} : vector<16x32xf32> to vector<16x8xf32>
    %47 = vector.extract_strided_slice %10 {offsets = [0, 16], sizes = [16, 8], strides = [1, 1]} : vector<16x32xf32> to vector<16x8xf32>
    %48 = vector.extract_strided_slice %11 {offsets = [0, 16], sizes = [16, 8], strides = [1, 1]} : vector<16x32xf32> to vector<16x8xf32>
    %cst_19 = arith.constant dense<0.000000e+00> : vector<16x16xf32>
    %49 = tpu.matmul %46, %47, %cst_19 {dimension_numbers = #tpu.dot_dimension_numbers<[1], [1], [0], [0], [0, 0, 1, 0], [], []>} : vector<16x8xf32>, vector<16x8xf32>, vector<16x16xf32> -> vector<16x16xf32>
    %50 = arith.addf %49, %1 : vector<16x16xf32>
    %cst_20 = arith.constant dense<0xFF800000> : vector<16xf32>
    %51 = vector.multi_reduction <maximumf>, %50, %cst_20 [1] : vector<16x16xf32> to vector<16xf32>
    %52 = vector.shape_cast %51 : vector<16xf32> to vector<16x1xf32>
    %53 = vector.broadcast %52 : vector<16x1xf32> to vector<16x16xf32>
    %54 = arith.subf %50, %53 : vector<16x16xf32>
    %55 = math.exp %54 : vector<16x16xf32>
    %cst_21 = arith.constant dense<0.000000e+00> : vector<16xf32>
    %56 = vector.multi_reduction <add>, %55, %cst_21 [1] : vector<16x16xf32> to vector<16xf32>
    %57 = vector.shape_cast %56 : vector<16xf32> to vector<16x1xf32>
    %58 = tpu.reciprocal %57 {approx = true} : vector<16x1xf32> -> vector<16x1xf32>
    %59 = vector.broadcast %58 : vector<16x1xf32> to vector<16x16xf32>
    %60 = arith.mulf %55, %59 : vector<16x16xf32>
    %cst_22 = arith.constant dense<0.000000e+00> : vector<16x8xf32>
    %61 = tpu.matmul %60, %48, %cst_22 {dimension_numbers = #tpu.dot_dimension_numbers<[1], [0], [0], [1], [0, 0, 1, 1], [], []>} : vector<16x16xf32>, vector<16x8xf32>, vector<16x8xf32> -> vector<16x8xf32>
    %c0_23 = arith.constant 0 : index
    %c16 = arith.constant 16 : index
    %62 = vector.load %arg8[%c0_23, %c16] : memref<16x32xf32, #tpu.memory_space<vmem>>, vector<16x8xf32>
    tpu.vector_store %arg8[%c0_23, %c16], %61 {strides = array<i32>} : memref<16x32xf32, #tpu.memory_space<vmem>>, vector<16x8xf32>,
    %63 = vector.extract_strided_slice %9 {offsets = [0, 24], sizes = [16, 8], strides = [1, 1]} : vector<16x32xf32> to vector<16x8xf32>
    %64 = vector.extract_strided_slice %10 {offsets = [0, 24], sizes = [16, 8], strides = [1, 1]} : vector<16x32xf32> to vector<16x8xf32>
    %65 = vector.extract_strided_slice %11 {offsets = [0, 24], sizes = [16, 8], strides = [1, 1]} : vector<16x32xf32> to vector<16x8xf32>
    %cst_24 = arith.constant dense<0.000000e+00> : vector<16x16xf32>
    %66 = tpu.matmul %63, %64, %cst_24 {dimension_numbers = #tpu.dot_dimension_numbers<[1], [1], [0], [0], [0, 0, 1, 0], [], []>} : vector<16x8xf32>, vector<16x8xf32>, vector<16x16xf32> -> vector<16x16xf32>
    %67 = arith.addf %66, %1 : vector<16x16xf32>
    %cst_25 = arith.constant dense<0xFF800000> : vector<16xf32>
    %68 = vector.multi_reduction <maximumf>, %67, %cst_25 [1] : vector<16x16xf32> to vector<16xf32>
    %69 = vector.shape_cast %68 : vector<16xf32> to vector<16x1xf32>
    %70 = vector.broadcast %69 : vector<16x1xf32> to vector<16x16xf32>
    %71 = arith.subf %67, %70 : vector<16x16xf32>
    %72 = math.exp %71 : vector<16x16xf32>
    %cst_26 = arith.constant dense<0.000000e+00> : vector<16xf32>
    %73 = vector.multi_reduction <add>, %72, %cst_26 [1] : vector<16x16xf32> to vector<16xf32>
    %74 = vector.shape_cast %73 : vector<16xf32> to vector<16x1xf32>
    %75 = tpu.reciprocal %74 {approx = true} : vector<16x1xf32> -> vector<16x1xf32>
    %76 = vector.broadcast %75 : vector<16x1xf32> to vector<16x16xf32>
    %77 = arith.mulf %72, %76 : vector<16x16xf32>
    %cst_27 = arith.constant dense<0.000000e+00> : vector<16x8xf32>
    %78 = tpu.matmul %77, %65, %cst_27 {dimension_numbers = #tpu.dot_dimension_numbers<[1], [0], [0], [1], [0, 0, 1, 1], [], []>} : vector<16x16xf32>, vector<16x8xf32>, vector<16x8xf32> -> vector<16x8xf32>
    %c0_28 = arith.constant 0 : index
    %c24 = arith.constant 24 : index
    %79 = vector.load %arg8[%c0_28, %c24] : memref<16x32xf32, #tpu.memory_space<vmem>>, vector<16x8xf32>
    tpu.vector_store %arg8[%c0_28, %c24], %78 {strides = array<i32>} : memref<16x32xf32, #tpu.memory_space<vmem>>, vector<16x8xf32>,
    %c0_29 = arith.constant 0 : index
    %c0_30 = arith.constant 0 : index
    %80 = vector.load %arg8[%c0_29, %c0_30] : memref<16x32xf32, #tpu.memory_space<vmem>>, vector<16x32xf32>
    %c0_31 = arith.constant 0 : index
    %c0_32 = arith.constant 0 : index
    %81 = vector.load %arg4[%c0_31, %c0_32] : memref<32x32xf32, #tpu.memory_space<vmem>>, vector<32x32xf32>
    %cst_33 = arith.constant dense<0.000000e+00> : vector<16x32xf32>
    %82 = tpu.matmul %80, %81, %cst_33 {dimension_numbers = #tpu.dot_dimension_numbers<[1], [0], [0], [1], [0, 0, 1, 1], [], []>} : vector<16x32xf32>, vector<32x32xf32>, vector<16x32xf32> -> vector<16x32xf32>
    %cst_34 = arith.constant 0.000000e+00 : f32
    %83 = vector.broadcast %cst_34 : f32 to vector<4x32xf32>
    %84 = vector.extract_strided_slice %82 {offsets = [0, 0], sizes = [4, 32], strides = [1, 1]} : vector<16x32xf32> to vector<4x32xf32>
    %85 = arith.addf %83, %84 : vector<4x32xf32>
    %86 = vector.extract_strided_slice %82 {offsets = [4, 0], sizes = [4, 32], strides = [1, 1]} : vector<16x32xf32> to vector<4x32xf32>
    %87 = arith.addf %85, %86 : vector<4x32xf32>
    %88 = vector.extract_strided_slice %82 {offsets = [8, 0], sizes = [4, 32], strides = [1, 1]} : vector<16x32xf32> to vector<4x32xf32>
    %89 = arith.addf %87, %88 : vector<4x32xf32>
    %90 = vector.extract_strided_slice %82 {offsets = [12, 0], sizes = [4, 32], strides = [1, 1]} : vector<16x32xf32> to vector<4x32xf32>
    %91 = arith.addf %89, %90 : vector<4x32xf32>
    %cst_35 = arith.constant 2.500000e-01 : f32
    %92 = vector.broadcast %cst_35 : f32 to vector<4x32xf32>
    %93 = arith.mulf %91, %92 : vector<4x32xf32>
    %c0_36 = arith.constant 0 : index
    %c0_37 = arith.constant 0 : index
    %94 = vector.load %arg5[%c0_36, %c0_37] : memref<1x32xf32, #tpu.memory_space<vmem>>, vector<1x32xf32>
    %95 = vector.broadcast %94 : vector<1x32xf32> to vector<4x32xf32>
    %96 = arith.addf %93, %95 : vector<4x32xf32>
    %c0_38 = arith.constant 0 : index
    %c0_39 = arith.constant 0 : index
    %97 = vector.load %arg7[%c0_38, %c0_39] : memref<4x32xf32, #tpu.memory_space<vmem>>, vector<4x32xf32>
    tpu.vector_store %arg7[%c0_38, %c0_39], %96 {strides = array<i32>} : memref<4x32xf32, #tpu.memory_space<vmem>>, vector<4x32xf32>,
    return
  }
  func.func @transform_0(%arg0: i32) -> (i32, i32) {
    %c0_i32 = arith.constant 0 : i32
    %c0_i32_0 = arith.constant 0 : i32
    %c0_i32_1 = arith.constant 0 : i32
    return %c0_i32, %c0_i32_0 : i32, i32
  }
  func.func @transform_1(%arg0: i32) -> (i32, i32) {
    %c0_i32 = arith.constant 0 : i32
    %c0_i32_0 = arith.constant 0 : i32
    %c0_i32_1 = arith.constant 0 : i32
    return %c0_i32, %c0_i32_0 : i32, i32
  }
  func.func @transform_2(%arg0: i32) -> (i32, i32) {
    %c0_i32 = arith.constant 0 : i32
    %c0_i32_0 = arith.constant 0 : i32
    %c0_i32_1 = arith.constant 0 : i32
    return %c0_i32, %c0_i32_0 : i32, i32
  }
  func.func @transform_3(%arg0: i32) -> (i32, i32) {
    %c0_i32 = arith.constant 0 : i32
    %c0_i32_0 = arith.constant 0 : i32
    %c0_i32_1 = arith.constant 0 : i32
    return %c0_i32, %c0_i32_0 : i32, i32
  }
  func.func @transform_4(%arg0: i32) -> (i32, i32) {
    %c0_i32 = arith.constant 0 : i32
    %c0_i32_0 = arith.constant 0 : i32
    %c0_i32_1 = arith.constant 0 : i32
    return %c0_i32, %c0_i32_0 : i32, i32
  }
  func.func @transform_5(%arg0: i32) -> (i32, i32) {
    %c0_i32 = arith.constant 0 : i32
    %c0_i32_0 = arith.constant 0 : i32
    %c0_i32_1 = arith.constant 0 : i32
    return %c0_i32, %c0_i32_0 : i32, i32
  }
  func.func @transform_6(%arg0: i32) -> (i32, i32) {
    %c0_i32 = arith.constant 0 : i32
    %c0_i32_0 = arith.constant 0 : i32
    %c0_i32_1 = arith.constant 0 : i32
    return %c0_i32, %c0_i32_0 : i32, i32
  }
}

</mosaic_0001>

<bundles_post_ra>
// kernel: tpu_custom_call.1
= control target key start
LH: loop header
LB: loop body
LE: loop exit
PB: predicated region body
PF: predicated region fallthrough
CT: control target
= control target key end

     0   :  { %11 = vsyncpa [#allocation4], 0  ;;  %s1652_s0 = inlined_call_operand.hbm [shape: f32[16,32], index: 0, kind: input, shape index: {}]   ;;  %s1653_s1 = inlined_call_operand.hbm [shape: f32[32,96], index: 1, kind: input, shape index: {}]   ;;  %s1654_s2 = inlined_call_operand.vmem [shape: f32[1,96], index: 2, kind: input, shape index: {}]   ;;  %s1655_s3 = inlined_call_operand.hbm [shape: f32[32,32], index: 3, kind: input, shape index: {}]   ;;  %s1656_s4 = inlined_call_operand.vmem [shape: f32[1,32], index: 4, kind: input, shape index: {}]   ;;  %s1657_s5 = inlined_call_operand.hbm [shape: f32[16,16], index: 5, kind: input, shape index: {}]   ;;  %s1658_s6 = inlined_call_operand.hbm [shape: f32[4,32], index: 6, kind: output, shape index: {}]  }
   0x1   :  { %12 = vsyncpa [#allocation7], 0 }
   0x2   :  { %13 = vsyncpa [#allocation10], 0 }
   0x3   :  { %14 = vsyncpa [#allocation5], 0  ;;  %s1452_s21 = smov [#allocation6]   ;;  %s1453_s23 = smov [#allocation3]  }
   0x4   :  { %s32_s22 = sshll.u32 %s1452_s21, 4  ;;  %s20_s24 = sshll.u32 %s1453_s23, 4  ;;  %s33_s22 = int_to_ptr.vmem [resolvable:$true] %s32_s22  ;;  %s21_s24 = int_to_ptr.vmem [resolvable:$true] %s20_s24 }
   0x5   :  { %s1352_s25 = scalar_lea.vmem %s33_s22, 512  ;;  %p1357_p1 = scmp.lt.s32.totalorder %s33_s22, %s33_s22 }
   0x6   :  { %p1353_p0 = scmp.ne.s32.totalorder %s33_s22, %s1352_s25  ;;  %p1358_p2 = scmp.lt.s32.totalorder %s1352_s25, %s1352_s25 }
   0x8   :  { %p1359_p3 = por %p1358_p2, %p1357_p1 }
   0xa   :  { %p1360_p4 = pnand %p1359_p3, %p1353_p0 }
   0xc   :  { %1363 = shalt.err (!%p1360_p4)
}
   0xd   :  { %s1454_s26 = smov 128   ;;  %s1455_s27 = smov 8  }
   0xe   :  { %38 = dma.hbm_to_vmem [thread:$0]  %s1653_s1, 512, %s33_s22, [#allocation7], %s1454_s26, %s1454_s26, %s1455_s27  }
   0xf   :  { %s1372_s30 = scalar_lea.vmem %s21_s24, 256  ;;  %p1377_p6 = scmp.lt.s32.totalorder %s21_s24, %s21_s24 }
  0x10   :  { %p1373_p5 = scmp.ne.s32.totalorder %s21_s24, %s1372_s30  ;;  %p1378_p7 = scmp.lt.s32.totalorder %s1372_s30, %s1372_s30 }
  0x12   :  { %p1379_p8 = por %p1378_p7, %p1377_p6 }
  0x14   :  { %p1380_p9 = pnand %p1379_p8, %p1373_p5 }
  0x16   :  { %1383 = shalt.err (!%p1380_p9)
}
  0x17   :  { %26 = dma.hbm_to_vmem [thread:$0]  %s1652_s0, 256, %s21_s24, [#allocation4], %s1454_s26, %s1454_s26, %s1455_s27  }
  0x18   :  { %s1456_s9 = smov [#allocation8]   ;;  %s1457_s11 = smov [#allocation9]  }
  0x19   :  { %s46_s10 = sshll.u32 %s1456_s9, 4  ;;  %s60_s12 = sshll.u32 %s1457_s11, 4  ;;  %s47_s10 = int_to_ptr.vmem [resolvable:$true] %s46_s10  ;;  %s61_s12 = int_to_ptr.vmem [resolvable:$true] %s60_s12 }
  0x1a   :  { %s1392_s1 = scalar_lea.vmem %s47_s10, 512  ;;  %p1397_p11 = scmp.lt.s32.totalorder %s47_s10, %s47_s10 }
  0x1b   :  { %p1393_p10 = scmp.ne.s32.totalorder %s47_s10, %s1392_s1  ;;  %p1398_p12 = scmp.lt.s32.totalorder %s1392_s1, %s1392_s1 }
  0x1d   :  { %p1399_p13 = por %p1398_p12, %p1397_p11 }
  0x1f   :  { %p1400_p0 = pnand %p1399_p13, %p1393_p10 }
  0x21   :  { %1403 = shalt.err (!%p1400_p0)
}
  0x22   :  { %52 = dma.hbm_to_vmem [thread:$0]  %s1655_s3, 512, %s47_s10, [#allocation7], %s1454_s26, %s1454_s26, %s1455_s27  }
  0x23   :  { %s1412_s0 = scalar_lea.vmem %s61_s12, 256  ;;  %p1417_p2 = scmp.lt.s32.totalorder %s61_s12, %s61_s12 }
  0x24   :  { %p1413_p1 = scmp.ne.s32.totalorder %s61_s12, %s1412_s0  ;;  %p1418_p3 = scmp.lt.s32.totalorder %s1412_s0, %s1412_s0 }
  0x26   :  { %p1419_p4 = por %p1418_p3, %p1417_p2 }
  0x28   :  { %p1420_p5 = pnand %p1419_p4, %p1413_p1 }
  0x2a   :  { %1423 = shalt.err (!%p1420_p5)
}
  0x2b   :  { %66 = dma.hbm_to_vmem [thread:$0]  %s1657_s5, 256, %s61_s12, [#allocation10], %s1454_s26, %s1454_s26, %s1455_s27  }
  0x2c   :  { %1444 = dma.done.wait [#allocation4], 256  }
  0x2d   :  { %1445 = vsyncadd [#allocation4], 4294967040 }
  0x2e   :  { %1446 = dma.done.wait [#allocation7], 1024  }
  0x2f   :  { %1447 = vsyncadd [#allocation7], 4294966272 }
  0x30   :  { %1448 = dma.done.wait [#allocation10], 256  }
  0x31   :  { %1449 = vsyncadd [#allocation10], 4294967040  ;;  %vm94_vm0 = vcmask 261120   ;;  %v86_v0 = vld [vmem:[#allocation6 + $0x18] sm:$0xff]  ;;  %v85_v1 = vld [vmem:[#allocation6 + $0x10] sm:$0xff]  ;;  %s1458_s17 = smov 96  }
  0x32   :  { %1214 = vmatprep.subr.mxu0 %v86_v0  ;;  %v79_v2 = vld [vmem:[#allocation3] sm:$0xff]  ;;  %v84_v3 = vld [vmem:[#allocation6 + $0x8] sm:$0xff]  ;;  %v83_v4 = vld [vmem:[#allocation6] sm:$0xff]  ;;  %vm184_vm1 = vcmask 64512   ;;  %vm270_vm2 = vcmask 130048   ;;  %s1460_s18 = smov 120  }
  0x33   :  { %1215 = vmatpush3.msra.mxu0 %v86_v0  ;;  %1222 = vmatprep.mubr.msk.f32.mxu0 %vm94_vm0, %v79_v2  ;;  %v80_v5 = vld [vmem:[#allocation3 + $0x8] sm:$0xff]  ;;  %v1140_v6 = vld [vmem:[%s1654_s2] ss:$0 sm:$0xff]  ;;  %v1558_v17 = vld [vmem:[#allocation9 + $0x8] sm:$0xff]  ;;  %s1459_s2 = smov 64   ;;  %s1461_s19 = smov 88  }
  0x34   :  { %1216 = vmatprep.subr.mxu0 %v85_v1  ;;  %v1556_v16 = vld [vmem:[#allocation9] sm:$0xff]  ;;  %s1462_s20 = smov 56   ;;  %s1463_s21 = smov 80   ;;  %vm590_vm3 = vcmask 130112   ;;  %vm801_vm4 = vcmask 195712   ;;  %vm1012_vm5 = vcmask 261312  }
  0x35   :  { %1217 = vmatpush3.msra.mxu0 %v85_v1  ;;  %s1464_s22 = smov 112   ;;  %s1465_s23 = smov 48   ;;  %vm1121_vm6 = vcmask 257024  }
  0x36   :  { %1218 = vmatprep.subr.mxu0 %v84_v3  ;;  %s1466_s24 = smov 72   ;;  %s1467_s25 = smov 104  }
  0x37   :  { %1219 = vmatpush3.msra.mxu0 %v84_v3  ;;  %s1468_s26 = smov 40   ;;  %s1469_s28 = smov 16  }
  0x38   :  { %1220 = vmatprep.subr.mxu0 %v83_v4  ;;  %s1471_s7 = smov [#allocation11]  }
  0x39   :  { %1221 = vmatpush3.msra.mxu0 %v83_v4  ;;  %s1129_s8 = sshll.u32 %s1471_s7, 4  ;;  %s1130_s8 = int_to_ptr.vmem [resolvable:$true] %s1129_s8 }
  0x3a   :  { %1223 = vmatmul.mubr.msk.f32.vlgmr.msra.gmra.mxu0 %vm94_vm0, %v80_v5  ;;  %s1424_s9 = scalar_lea.vmem %s1130_s8, 64  ;;  %p1429_p7 = scmp.lt.s32.totalorder %s1130_s8, %s1130_s8 }
  0x3b   :  { %p1425_p6 = scmp.ne.s32.totalorder %s1130_s8, %s1424_s9  ;;  %p1430_p8 = scmp.lt.s32.totalorder %s1424_s9, %s1424_s9 }
  0x3d   :  { %p1431_p9 = por %p1430_p8, %p1429_p7 }
  0x3f   :  { %p1432_p10 = pnand %p1431_p9, %p1425_p6 }
  0xfa   :  { %v1224_v7 = vpop.f32.mrf.mxu0 }
  0xfb   :  { %v1536_v8 = vadd.f32 %v1224_v7, %v1140_v6 }
  0xfc   :  { %v167_v9 = vpop.f32.mrf.mxu0 }
  0xfd   :  { %v1538_v10 = vadd.f32 %v1140_v6, %v167_v9  ;;  %182 = vrot.lane.b32.xlu0 %v1536_v8, %s1458_s17  ;;  %v1552_v14 = vmul.f32 0.35355338, %v1536_v8 }
  0xff   :  { %v1542_v11 = vmul.f32 0.35355338, %v1538_v10 }
 0x101   :  { %180 = vrot.lane.b32.xlu0 %v1538_v10, %s1458_s17  ;;  %1229 = vmatprep.mubr.msk.f32.mxu1 %vm184_vm1, %v1542_v11 }
 0x16f   :  { %v183_v12 = vpop.permute.xlu0 %182 }
 0x170   :  { %1225 = vmatprep.subr.msk.mxu1 %vm184_vm1, %v183_v12 }
 0x171   :  { %1226 = vmatpush3.xpose.msk.msra.mxu1 %vm184_vm1, %v183_v12 }
 0x173   :  { %v181_v13 = vpop.permute.xlu0 %180 }
 0x174   :  { %1227 = vmatprep.subr.msk.mxu1 %vm184_vm1, %v181_v13 }
 0x175   :  { %1228 = vmatpush3.xpose.msk.msra.mxu1 %vm184_vm1, %v181_v13 }
 0x178   :  { %1230 = vmatmul.mubr.msk.f32.vlgmr.msra.gmra.mxu1 %vm184_vm1, %v1552_v14 }
 0x238   :  { %v1231_v15 = vpop.f32.mrf.mxu1 }
 0x239   :  { %v267_v20 = vadd.f32 %v1231_v15, %v1558_v17 }
 0x23a   :  { %v261_v18 = vpop.f32.mrf.mxu1 }
 0x23b   :  { %v262_v19 = vadd.f32 %v261_v18, %v1556_v16  ;;  %v274_v22 = vsel %vm270_vm2, %v267_v20, -inf }
 0x23d   :  { %v271_v21 = vsel %vm270_vm2, %v262_v19, -inf }
 0x23e   :  { %272 = vmax.xlane.f32.xlu1 %v271_v21 }
 0x242   :  { %275 = vmax.xlane.f32.xlu1 %v274_v22 }
 0x2c7   :  { %v273_v23 = vpop.xlane.xlu1 %272 }
 0x2c8   :  { %v277_v24 = vsub.f32 %v262_v19, %v273_v23 }
 0x2ca   :  { %v279_v25 = vmul.f32 1.442695, %v277_v24 }
 0x2cb   :  { %v276_v26 = vpop.xlane.xlu1 %275 }
 0x2cc   :  { %1312 = vpow2.f32 %v279_v25  ;;  %v278_v27 = vsub.f32 %v267_v20, %v276_v26 }
 0x2ce   :  { %v281_v28 = vmul.f32 1.442695, %v278_v27 }
 0x2d0   :  { %1314 = vpow2.f32 %v281_v28 }
 0x2d9   :  { %v1313_v29 = vpop.eup %1312 }
 0x2da   :  { %v283_v30 = vsel %vm270_vm2, %v1313_v29, 0.0 }
 0x2db   :  { %284 = vadd.xlane.f32.xlu0 %v283_v30 }
 0x2dd   :  { %v1315_v31 = vpop.eup %1314 }
 0x2de   :  { %v286_v32 = vsel %vm270_vm2, %v1315_v31, 0.0 }
 0x2df   :  { %287 = vadd.xlane.f32.xlu1 %v286_v32 }
 0x2f0   :  { %295 = vrot.lane.b32.xlu1 %v1536_v8, %s1459_s2 }
 0x2f1   :  { %382 = vrot.lane.b32.xlu0 %v1542_v11, %s1460_s18 }
 0x2f4   :  { %293 = vrot.lane.b32.xlu1 %v1538_v10, %s1459_s2 }
 0x2f8   :  { %388 = vrot.lane.b32.xlu1 %v1536_v8, %s1461_s19 }
 0x2fc   :  { %386 = vrot.lane.b32.xlu1 %v1538_v10, %s1461_s19 }
 0x300   :  { %384 = vrot.lane.b32.xlu1 %v1552_v14, %s1460_s18 }
 0x364   :  { %v285_v33 = vpop.xlane.xlu0 %284 }
 0x365   :  { %1316 = vrcp.f32 %v285_v33 }
 0x368   :  { %v288_v34 = vpop.xlane.xlu1 %287  ;;  %v383_v43 = vpop.permute.xlu0 %382 }
 0x369   :  { %1318 = vrcp.f32 %v288_v34 }
 0x36c   :  { %v296_v35 = vpop.permute.xlu1 %295 }
 0x36d   :  { %1232 = vmatprep.subr.mxu1 %v296_v35 }
 0x36e   :  { %1233 = vmatpush3.msra.mxu1 %v296_v35 }
 0x370   :  { %v294_v36 = vpop.permute.xlu1 %293 }
 0x371   :  { %1234 = vmatprep.subr.mxu1 %v294_v36 }
 0x372   :  { %v1317_v37 = vpop.eup %1316  ;;  %1235 = vmatpush3.msra.mxu1 %v294_v36 }
 0x373   :  { %v291_v38 = vmul.f32 %v1317_v37, %v1313_v29 }
 0x374   :  { %v389_v39 = vpop.permute.xlu1 %388 }
 0x375   :  { %1236 = vmatprep.mubr.msk.f32.mxu1 %vm270_vm2, %v291_v38  ;;  %1239 = vmatprep.subr.msk.mxu1 %vm184_vm1, %v389_v39 }
 0x376   :  { %v1319_v40 = vpop.eup %1318 }
 0x377   :  { %v292_v41 = vmul.f32 %v1319_v40, %v1315_v31 }
 0x378   :  { %v387_v42 = vpop.permute.xlu1 %386 }
 0x379   :  { %1237 = vmatmul.mubr.msk.f32.vlgmr.msra.gmra.mxu1 %vm270_vm2, %v292_v41 }
 0x37a   :  { %1240 = vmatpush3.xpose.msk.msra.mxu1 %vm184_vm1, %v389_v39  ;;  %1243 = vmatprep.mubr.msk.f32.mxu1 %vm184_vm1, %v383_v43 }
 0x37b   :  { %1241 = vmatprep.subr.msk.mxu1 %vm184_vm1, %v387_v42 }
 0x37c   :  { %v385_v44 = vpop.permute.xlu1 %384 }
 0x37e   :  { %1242 = vmatpush3.xpose.msk.msra.mxu1 %vm184_vm1, %v387_v42 }
 0x381   :  { %1244 = vmatmul.mubr.msk.f32.vlgmr.msra.gmra.mxu1 %vm184_vm1, %v385_v44 }
 0x439   :  { %v1238_v45 = vpop.f32.mrf.mxu1 }
 0x43a   :  { %381 = vst.msk [vmem:[#allocation2 + $0x8] sm:$0xff] %vm184_vm1, %v1238_v45 }
 0x43b   :  { %v371_v46 = vpop.f32.mrf.mxu1 }
 0x43c   :  { %380 = vst.msk [vmem:[#allocation2] sm:$0xff] %vm184_vm1, %v371_v46 }
 0x441   :  { %v1245_v47 = vpop.f32.mrf.mxu1 }
 0x442   :  { %v470_v48 = vadd.f32 %v1245_v47, %v1558_v17 }
 0x443   :  { %v464_v49 = vpop.f32.mrf.mxu1 }
 0x444   :  { %v465_v50 = vadd.f32 %v464_v49, %v1556_v16  ;;  %v476_v51 = vsel %vm270_vm2, %v470_v48, -inf }
 0x445   :  { %477 = vmax.xlane.f32.xlu0 %v476_v51 }
 0x446   :  { %v473_v52 = vsel %vm270_vm2, %v465_v50, -inf }
 0x447   :  { %474 = vmax.xlane.f32.xlu1 %v473_v52 }
 0x458   :  { %497 = vrot.lane.b32.xlu1 %v1536_v8, %s1462_s20 }
 0x45b   :  { %495 = vrot.lane.b32.xlu0 %v1538_v10, %s1462_s20 }
 0x45c   :  { %599 = vrot.lane.b32.xlu1 %v1536_v8, %s1463_s21 }
 0x45f   :  { %593 = vrot.lane.b32.xlu0 %v1542_v11, %s1464_s22 }
 0x460   :  { %597 = vrot.lane.b32.xlu1 %v1538_v10, %s1463_s21 }
 0x4ce   :  { %v478_v53 = vpop.xlane.xlu0 %477 }
 0x4cf   :  { %v480_v54 = vsub.f32 %v470_v48, %v478_v53 }
 0x4d0   :  { %v475_v55 = vpop.xlane.xlu1 %474 }
 0x4d1   :  { %v483_v56 = vmul.f32 1.442695, %v480_v54  ;;  %v479_v57 = vsub.f32 %v465_v50, %v475_v55 }
 0x4d2   :  { %v496_v60 = vpop.permute.xlu0 %495 }
 0x4d3   :  { %1320 = vpow2.f32 %v483_v56  ;;  %v481_v58 = vmul.f32 1.442695, %v479_v57 }
 0x4d4   :  { %v498_v59 = vpop.permute.xlu1 %497 }
 0x4d5   :  { %1322 = vpow2.f32 %v481_v58  ;;  %1246 = vmatprep.subr.mxu0 %v498_v59 }
 0x4d6   :  { %1247 = vmatpush3.msra.mxu0 %v498_v59  ;;  %v594_v12 = vpop.permute.xlu0 %593 }
 0x4d7   :  { %1248 = vmatprep.subr.mxu0 %v496_v60 }
 0x4d8   :  { %1249 = vmatpush3.msra.mxu0 %v496_v60  ;;  %v600_v61 = vpop.permute.xlu1 %599 }
 0x4d9   :  { %1253 = vmatprep.subr.msk.mxu0 %vm184_vm1, %v600_v61 }
 0x4dc   :  { %v598_v2 = vpop.permute.xlu1 %597 }
 0x4e0   :  { %v1321_v62 = vpop.eup %1320 }
 0x4e1   :  { %v488_v63 = vsel %vm270_vm2, %v1321_v62, 0.0 }
 0x4e2   :  { %v1323_v0 = vpop.eup %1322  ;;  %489 = vadd.xlane.f32.xlu1 %v488_v63 }
 0x4e3   :  { %v485_v1 = vsel %vm270_vm2, %v1323_v0, 0.0 }
 0x4e6   :  { %486 = vadd.xlane.f32.xlu1 %v485_v1 }
 0x4f7   :  { %595 = vrot.lane.b32.xlu1 %v1552_v14, %s1464_s22 }
 0x56b   :  { %v490_v3 = vpop.xlane.xlu1 %489 }
 0x56c   :  { %1324 = vrcp.f32 %v490_v3 }
 0x56f   :  { %v487_v4 = vpop.xlane.xlu1 %486 }
 0x570   :  { %1326 = vrcp.f32 %v487_v4 }
 0x573   :  { %v596_v13 = vpop.permute.xlu1 %595 }
 0x579   :  { %v1325_v5 = vpop.eup %1324 }
 0x57a   :  { %v494_v9 = vmul.f32 %v1325_v5, %v1321_v62 }
 0x57d   :  { %v1327_v6 = vpop.eup %1326 }
 0x57e   :  { %v493_v7 = vmul.f32 %v1327_v6, %v1323_v0 }
 0x580   :  { %1250 = vmatprep.mubr.msk.f32.mxu0 %vm270_vm2, %v493_v7 }
 0x581   :  { %1251 = vmatmul.mubr.msk.f32.vlgmr.msra.gmra.mxu0 %vm270_vm2, %v494_v9  ;;  %v1019_v9 = vld [vmem:[#allocation8 + $0x10] sm:$0xff] }
 0x582   :  { %1254 = vmatpush3.xpose.msk.msra.mxu0 %vm184_vm1, %v600_v61  ;;  %1257 = vmatprep.mubr.msk.f32.mxu0 %vm184_vm1, %v594_v12  ;;  %v1018_v12 = vld [vmem:[#allocation8 + $0x8] sm:$0xff] }
 0x583   :  { %1255 = vmatprep.subr.msk.mxu0 %vm184_vm1, %v598_v2 }
 0x586   :  { %1256 = vmatpush3.xpose.msk.msra.mxu0 %vm184_vm1, %v598_v2 }
 0x589   :  { %1258 = vmatmul.mubr.msk.f32.vlgmr.msra.gmra.mxu0 %vm184_vm1, %v596_v13  ;;  %v1017_v13 = vld [vmem:[#allocation8] sm:$0xff] }
 0x641   :  { %v1602_v15 = vpop.f32.mrf.mxu0 }
 0x643   :  { %v1604_v18 = vpop.f32.mrf.mxu0 }
 0x649   :  { %v1259_v19 = vpop.f32.mrf.mxu0 }
 0x64a   :  { %v681_v20 = vadd.f32 %v1259_v19, %v1558_v17 }
 0x64b   :  { %v675_v21 = vpop.f32.mrf.mxu0 }
 0x64c   :  { %v676_v22 = vadd.f32 %v675_v21, %v1556_v16  ;;  %v687_v23 = vsel %vm270_vm2, %v681_v20, -inf }
 0x64d   :  { %688 = vmax.xlane.f32.xlu1 %v687_v23 }
 0x64e   :  { %v684_v24 = vsel %vm270_vm2, %v676_v22, -inf }
 0x64f   :  { %685 = vmax.xlane.f32.xlu0 %v684_v24 }
 0x65e   :  { %708 = vrot.lane.b32.xlu1 %v1536_v8, %s1465_s23 }
 0x662   :  { %810 = vrot.lane.b32.xlu1 %v1536_v8, %s1466_s24 }
 0x666   :  { %808 = vrot.lane.b32.xlu1 %v1538_v10, %s1466_s24 }
 0x66a   :  { %806 = vrot.lane.b32.xlu1 %v1552_v14, %s1467_s25 }
 0x6d6   :  { %v689_v25 = vpop.xlane.xlu1 %688 }
 0x6d7   :  { %v691_v26 = vsub.f32 %v681_v20, %v689_v25 }
 0x6d8   :  { %v686_v27 = vpop.xlane.xlu0 %685 }
 0x6d9   :  { %v694_v28 = vmul.f32 1.442695, %v691_v26  ;;  %v690_v29 = vsub.f32 %v676_v22, %v686_v27 }
 0x6da   :  { %v709_v30 = vpop.permute.xlu1 %708 }
 0x6db   :  { %1328 = vpow2.f32 %v694_v28  ;;  %v692_v31 = vmul.f32 1.442695, %v690_v29  ;;  %1260 = vmatprep.subr.mxu1 %v709_v30 }
 0x6dc   :  { %1261 = vmatpush3.msra.mxu1 %v709_v30  ;;  %v1169_v30 = vld [vmem:[%s1656_s4] ss:$0 sm:$0xff] }
 0x6dd   :  { %1330 = vpow2.f32 %v692_v31 }
 0x6de   :  { %v811_v38 = vpop.permute.xlu1 %810 }
 0x6e8   :  { %v1329_v32 = vpop.eup %1328 }
 0x6e9   :  { %v699_v33 = vsel %vm270_vm2, %v1329_v32, 0.0 }
 0x6ea   :  { %v1331_v34 = vpop.eup %1330  ;;  %700 = vadd.xlane.f32.xlu0 %v699_v33 }
 0x6eb   :  { %v696_v35 = vsel %vm270_vm2, %v1331_v34, 0.0 }
 0x6ee   :  { %697 = vadd.xlane.f32.xlu0 %v696_v35 }
 0x704   :  { %706 = vrot.lane.b32.xlu0 %v1538_v10, %s1465_s23 }
 0x708   :  { %804 = vrot.lane.b32.xlu0 %v1542_v11, %s1467_s25  ;;  %v809_v11 = vpop.permute.xlu1 %808 }
 0x70c   :  { %v807_v44 = vpop.permute.xlu1 %806 }
 0x773   :  { %v701_v14 = vpop.xlane.xlu0 %700 }
 0x774   :  { %1332 = vrcp.f32 %v701_v14 }
 0x777   :  { %v698_v36 = vpop.xlane.xlu0 %697 }
 0x778   :  { %1334 = vrcp.f32 %v698_v36 }
 0x77b   :  { %v707_v37 = vpop.permute.xlu0 %706 }
 0x77c   :  { %1262 = vmatprep.subr.mxu1 %v707_v37 }
 0x77d   :  { %1263 = vmatpush3.msra.mxu1 %v707_v37 }
 0x77e   :  { %1267 = vmatprep.subr.msk.mxu1 %vm184_vm1, %v811_v38 }
 0x77f   :  { %v805_v43 = vpop.permute.xlu0 %804 }
 0x781   :  { %v1333_v39 = vpop.eup %1332 }
 0x782   :  { %v705_v42 = vmul.f32 %v1333_v39, %v1329_v32 }
 0x785   :  { %v1335_v40 = vpop.eup %1334 }
 0x786   :  { %v704_v41 = vmul.f32 %v1335_v40, %v1331_v34 }
 0x788   :  { %1264 = vmatprep.mubr.msk.f32.mxu1 %vm270_vm2, %v704_v41 }
 0x789   :  { %1265 = vmatmul.mubr.msk.f32.vlgmr.msra.gmra.mxu1 %vm270_vm2, %v705_v42 }
 0x78a   :  { %1268 = vmatpush3.xpose.msk.msra.mxu1 %vm184_vm1, %v811_v38  ;;  %1271 = vmatprep.mubr.msk.f32.mxu1 %vm184_vm1, %v805_v43 }
 0x78b   :  { %1269 = vmatprep.subr.msk.mxu1 %vm184_vm1, %v809_v11 }
 0x78e   :  { %1270 = vmatpush3.xpose.msk.msra.mxu1 %vm184_vm1, %v809_v11 }
 0x791   :  { %1272 = vmatmul.mubr.msk.f32.vlgmr.msra.gmra.mxu1 %vm184_vm1, %v807_v44 }
 0x849   :  { %v1266_v45 = vpop.f32.mrf.mxu1 }
 0x84b   :  { %v784_v46 = vpop.f32.mrf.mxu1 }
 0x851   :  { %v1273_v47 = vpop.f32.mrf.mxu1 }
 0x852   :  { %v892_v48 = vadd.f32 %v1273_v47, %v1558_v17 }
 0x853   :  { %v886_v49 = vpop.f32.mrf.mxu1 }
 0x854   :  { %v887_v50 = vadd.f32 %v886_v49, %v1556_v16  ;;  %v898_v51 = vsel %vm270_vm2, %v892_v48, -inf }
 0x855   :  { %899 = vmax.xlane.f32.xlu1 %v898_v51 }
 0x856   :  { %v895_v52 = vsel %vm270_vm2, %v887_v50, -inf }
 0x857   :  { %896 = vmax.xlane.f32.xlu0 %v895_v52 }
 0x866   :  { %919 = vrot.lane.b32.xlu1 %v1536_v8, %s1468_s26 }
 0x86a   :  { %584 = vrot.lane.b32.xlu1 %v1604_v18, %s1455_s27 }
 0x86e   :  { %586 = vrot.lane.b32.xlu1 %v1602_v15, %s1455_s27  ;;  %s1470_s27 = smov 24  }
 0x872   :  { %797 = vrot.lane.b32.xlu1 %v1266_v45, %s1469_s28 }
 0x8de   :  { %v900_v17 = vpop.xlane.xlu1 %899 }
 0x8df   :  { %v902_v16 = vsub.f32 %v892_v48, %v900_v17 }
 0x8e0   :  { %v897_v53 = vpop.xlane.xlu0 %896 }
 0x8e1   :  { %v905_v54 = vmul.f32 1.442695, %v902_v16  ;;  %v901_v55 = vsub.f32 %v887_v50, %v897_v53 }
 0x8e2   :  { %v920_v56 = vpop.permute.xlu1 %919 }
 0x8e3   :  { %1336 = vpow2.f32 %v905_v54  ;;  %v903_v57 = vmul.f32 1.442695, %v901_v55  ;;  %1274 = vmatprep.subr.mxu0 %v920_v56 }
 0x8e4   :  { %1275 = vmatpush3.msra.mxu0 %v920_v56 }
 0x8e5   :  { %1338 = vpow2.f32 %v903_v57 }
 0x8e6   :  { %v585_v8 = vpop.permute.xlu1 %584 }
 0x8e7   :  { %591 = vst.msk [vmem:[#allocation2] sm:$0xff] %vm590_vm3, %v585_v8 }
 0x8ea   :  { %v587_v58 = vpop.permute.xlu1 %586 }
 0x8eb   :  { %592 = vst.msk [vmem:[#allocation2 + $0x8] sm:$0xff] %vm590_vm3, %v587_v58 }
 0x8ee   :  { %v798_v59 = vpop.permute.xlu1 %797 }
 0x8ef   :  { %803 = vst.msk [vmem:[#allocation2 + $0x8] sm:$0xff] %vm801_vm4, %v798_v59 }
 0x8f0   :  { %v1337_v60 = vpop.eup %1336 }
 0x8f1   :  { %v910_v61 = vsel %vm270_vm2, %v1337_v60, 0.0 }
 0x8f2   :  { %v1339_v62 = vpop.eup %1338  ;;  %911 = vadd.xlane.f32.xlu0 %v910_v61 }
 0x8f3   :  { %v907_v63 = vsel %vm270_vm2, %v1339_v62, 0.0 }
 0x8f6   :  { %908 = vadd.xlane.f32.xlu0 %v907_v63 }
 0x90c   :  { %917 = vrot.lane.b32.xlu0 %v1538_v10, %s1468_s26  ;;  %v1020_v10 = vld [vmem:[#allocation8 + $0x18] sm:$0xff] }
 0x910   :  { %795 = vrot.lane.b32.xlu0 %v784_v46, %s1469_s28 }
 0x97b   :  { %v912_v0 = vpop.xlane.xlu0 %911 }
 0x97c   :  { %1340 = vrcp.f32 %v912_v0 }
 0x97f   :  { %v909_v1 = vpop.xlane.xlu0 %908 }
 0x980   :  { %1342 = vrcp.f32 %v909_v1 }
 0x983   :  { %v918_v2 = vpop.permute.xlu0 %917 }
 0x984   :  { %1276 = vmatprep.subr.mxu0 %v918_v2 }
 0x985   :  { %1277 = vmatpush3.msra.mxu0 %v918_v2 }
 0x986   :  { %1281 = vmatprep.subr.mxu0 %v1020_v10 }
 0x987   :  { %v796_v3 = vpop.permute.xlu0 %795 }
 0x988   :  { %802 = vst.msk [vmem:[#allocation2] sm:$0xff] %vm801_vm4, %v796_v3 }
 0x989   :  { %v1341_v4 = vpop.eup %1340 }
 0x98a   :  { %v916_v7 = vmul.f32 %v1341_v4, %v1337_v60 }
 0x98d   :  { %v1343_v5 = vpop.eup %1342 }
 0x98e   :  { %v915_v6 = vmul.f32 %v1343_v5, %v1339_v62 }
 0x990   :  { %1278 = vmatprep.mubr.msk.f32.mxu0 %vm270_vm2, %v915_v6 }
 0x991   :  { %1279 = vmatmul.mubr.msk.f32.vlgmr.msra.gmra.mxu0 %vm270_vm2, %v916_v7 }
 0x992   :  { %1282 = vmatpush3.msra.mxu0 %v1020_v10 }
 0x993   :  { %1283 = vmatprep.subr.mxu0 %v1019_v9 }
 0x994   :  { %1284 = vmatpush3.msra.mxu0 %v1019_v9 }
 0x995   :  { %1285 = vmatprep.subr.mxu0 %v1018_v12 }
 0x996   :  { %1286 = vmatpush3.msra.mxu0 %v1018_v12 }
 0x997   :  { %1287 = vmatprep.subr.mxu0 %v1017_v13 }
 0x998   :  { %1288 = vmatpush3.msra.mxu0 %v1017_v13 }
 0xa51   :  { %v1280_v15 = vpop.f32.mrf.mxu0 }
 0xa52   :  { %1008 = vrot.lane.b32.xlu1 %v1280_v15, %s1470_s27 }
 0xa53   :  { %v995_v18 = vpop.f32.mrf.mxu0 }
 0xa54   :  { %1006 = vrot.lane.b32.xlu0 %v995_v18, %s1470_s27 }
 0xac4   :  { %v1009_v19 = vpop.permute.xlu1 %1008 }
 0xac5   :  { %1014 = vst.msk [vmem:[#allocation2 + $0x8] sm:$0xff] %vm1012_vm5, %v1009_v19 }
 0xac6   :  { %v1007_v20 = vpop.permute.xlu0 %1006 }
 0xac7   :  { %1013 = vst.msk [vmem:[#allocation2] sm:$0xff] %vm1012_vm5, %v1007_v20 }
 0xacc   :  { %v1016_v22 = vld [vmem:[#allocation2 + $0x8] sm:$0xff] }
 0xace   :  { %v1015_v21 = vld [vmem:[#allocation2] sm:$0xff] }
 0xacf   :  { %1289 = vmatprep.mubr.msk.f32.mxu0 %vm94_vm0, %v1015_v21 }
 0xad0   :  { %1290 = vmatmul.mubr.msk.f32.vlgmr.msra.gmra.mxu0 %vm94_vm0, %v1016_v22 }
 0xb90   :  { %v1291_v23 = vpop.f32.mrf.mxu0 }
 0xb91   :  { %v1109_v27 = vrot.slane %v1291_v23, 4 }
 0xb92   :  { %v1093_v24 = vpop.f32.mrf.mxu0 }
 0xb93   :  { %v1104_v25 = vrot.slane %v1093_v24, 4 }
 0xb95   :  { %v1106_v26 = vadd.f32 %v1104_v25, %v1093_v24 }
 0xb97   :  { %v1107_v28 = vadd.f32 %v1291_v23, %v1106_v26 }
 0xb99   :  { %v1111_v29 = vadd.f32 %v1109_v27, %v1107_v28 }
 0xb9b   :  { %v1112_v31 = vmul.f32 0.25, %v1111_v29 }
 0xb9d   :  { %v1120_v32 = vadd.f32 %v1169_v30, %v1112_v31 }
 0xb9f   :  { %1122 = vst.msk [vmem:[#allocation11] sm:$0xf] %vm1121_vm6, %v1120_v32 }
 0xba0   :  { %1435 = shalt.err (!%p1432_p10)
}
 0xba1   :  { %1132 = dma.vmem_to_hbm [thread:$0]  %s1130_s8, 64, %s1658_s6, [#allocation5]  }
 0xba2   :  { %1450 = dma.done.wait [#allocation5], 64  }
 0xba3   :  { %1451 = vsyncadd [#allocation5], 4294967232 }
 0xba4   :  { %1136 = vsyncpa [#allocation4], 1 }
 0xba5   :  { %1137 = vsyncpa [#allocation7], 1 }
 0xba6   :  { %1138 = vsyncpa [#allocation10], 1 }
 0xba7   :  { %1139 = vsyncpa [#allocation5], 1 }

</bundles_post_ra>
